<compile_context>
chip_gen: v7x
topology: tpu7x:2x2x1
jax: 0.10.0
libtpu: 0.0.40
codegen_flags: <defaults>
</compile_context>

<pallas_src>
import jax
import jax.numpy as jnp
from jax.experimental import pallas as pl
from jax.experimental.pallas import tpu as pltpu


def _theta_encoder_kernel(theta_ref, out_ref):
    # theta_ref: (2, TB, TL)   out_ref: (12, TB, TL)
    t0 = theta_ref[0]
    t1 = theta_ref[1]

    # Only 4 transcendentals per element; sum/sub trig via angle-sum identities.
    s0 = jnp.sin(t0)
    c0 = jnp.cos(t0)
    s1 = jnp.sin(t1)
    c1 = jnp.cos(t1)
    sc = s0 * c1
    cs = c0 * s1
    cc = c0 * c1
    ss = s0 * s1

    out_ref[0] = t0
    out_ref[1] = s0
    out_ref[2] = c0
    out_ref[3] = t1
    out_ref[4] = s1
    out_ref[5] = c1
    out_ref[6] = t0 + t1
    out_ref[7] = sc + cs          # sin(t0 + t1)
    out_ref[8] = cc - ss          # cos(t0 + t1)
    out_ref[9] = t0 - t1
    out_ref[10] = sc - cs         # sin(t0 - t1)
    out_ref[11] = cc + ss         # cos(t0 - t1)
    # NOTE: ~10 live (TB, TL) temporaries; purely elementwise dataflow so Mosaic
    # schedules it tile-by-tile.  If a bundle dump ever shows spill traffic with
    # high ld/st slot utilization, strip-mine this body with an unrolled
    # lax.fori_loop over 8-sublane chunks.


def _round_up(x, m):
    return (x + m - 1) // m * m


def _choose_tile(dim, quantum, target):
    """Pick a tile for one (sublane/lane) axis.

    Returns (tile, padded_dim) with tile dividing padded_dim and either
    tile == padded_dim == dim (single full-axis block) or tile a multiple of
    `quantum` (the Mosaic (8, 128) rule).  Large axes with no friendly divisor
    are padded rather than taken as one oversized block."""
    target = max(quantum, (target // quantum) * quantum)
    if dim <= target:
        return dim, dim
    if dim % quantum == 0:
        for t in range(target, 0, -quantum):
            if dim % t == 0:
                return t, dim
    padded = _round_up(dim, quantum)
    for t in range(target, 0, -quantum):
        if padded % t == 0:
            return t, padded
    return quantum, padded


def theta_encoder(theta, *, interleave_output=True, tb_target=128, tl_target=1024):
    """theta: [B, lead_num, 2] -> [B, lead_num, 12] (PyTorch-exact, default), or
    the lane-dense plane-major [12, B, lead_num] fast path when
    interleave_output=False (skips the final HBM relayout pass; recommended for
    layout-aware consumers)."""
    b, lead_num, two = theta.shape
    assert two == 2, "theta last dim must be 2"

    # One channel-major relayout pass (cheap: 16 B/elem on the small input side)
    # instead of two strided 4-byte-granularity channel DMA streams; the kernel
    # then reads dense (2, TB, TL) blocks.
    theta_t = jnp.transpose(theta, (2, 0, 1))            # [2, B, L]

    tb, bp = _choose_tile(b, 8, tb_target)                # sublane axis
    tl, lp = _choose_tile(lead_num, 128, tl_target)       # lane axis

    # v7x has 2 TensorCores/chip: make sure a "parallel" axis has >=2 programs
    # when the shape allows it, otherwise one core idles.
    if bp // tb == 1 and lp // tl == 1:
        if tl % 256 == 0:
            tl //= 2
        elif tb % 16 == 0:
            tb //= 2

    if (bp, lp) != (b, lead_num):
        theta_t = jnp.pad(theta_t, ((0, 0), (0, bp - b), (0, lp - lead_num)))

    grid = (bp // tb, lp // tl)
    n_elem = bp * lp

    out_12bl = pl.pallas_call(
        _theta_encoder_kernel,
        out_shape=jax.ShapeDtypeStruct((12, bp, lp), theta.dtype),
        grid=grid,
        in_specs=[pl.BlockSpec((2, tb, tl), lambda i, j: (0, i, j))],
        out_specs=pl.BlockSpec((12, tb, tl), lambda i, j: (0, i, j)),
        compiler_params=pltpu.CompilerParams(
            dimension_semantics=("parallel", "parallel"),
            vmem_limit_bytes=48 * 1024 * 1024),
        cost_estimate=pl.CostEstimate(
            flops=10 * n_elem,
            transcendentals=4 * n_elem,
            bytes_accessed=56 * n_elem),
    )(theta_t)

    if (bp, lp) != (b, lead_num):
        out_12bl = out_12bl[:, :b, :lead_num]

    if interleave_output:
        # Exact PyTorch layout.  This is one extra HBM relayout pass; consumers
        # that can contract over the leading feature axis should instead use
        # interleave_output=False and take [12, B, L] directly.
        return jnp.transpose(out_12bl, (1, 2, 0))
    return out_12bl


def _reference(theta):
    t0 = theta[..., 0:1]
    t1 = theta[..., 1:2]
    before = jnp.concatenate([theta, t0 + t1, t0 - t1], axis=-1)     # [B, L, 4]
    stacked = jnp.stack([before, jnp.sin(before), jnp.cos(before)], axis=-1)
    return stacked.reshape(theta.shape[0], theta.shape[1], -1)


if __name__ == "__main__":
    key = jax.random.PRNGKey(0)
    k1, k2, k3 = jax.random.split(key, 3)

    # Small shape consistent with the module (single-block path).
    B, LEAD = 2, 8
    theta = jax.random.normal(k1, (B, LEAD, 2), dtype=jnp.float32)
    out = jax.block_until_ready(theta_encoder(theta))
    ref = _reference(theta)
    assert out.shape == (B, LEAD, 12), out.shape
    assert jnp.allclose(out, ref, atol=1e-5, rtol=1e-5)

    # Larger shape: exercises the tiled, multi-program grid (megacore split).
    B2, LEAD2 = 16, 1024
    theta2 = jax.random.normal(k2, (B2, LEAD2, 2), dtype=jnp.float32)
    out2 = jax.block_until_ready(theta_encoder(theta2))
    ref2 = _reference(theta2)
    assert out2.shape == (B2, LEAD2, 12), out2.shape
    assert jnp.allclose(out2, ref2, atol=1e-5, rtol=1e-5)

    # Lane-dense plane-major fast path ([12, B, L]) stays consistent.
    out2_planes = jax.block_until_ready(theta_encoder(theta2, interleave_output=False))
    assert out2_planes.shape == (12, B2, LEAD2), out2_planes.shape
    assert jnp.allclose(jnp.transpose(out2_planes, (1, 2, 0)), ref2, atol=1e-5, rtol=1e-5)

    # Awkward lead_num (> lane tile, not a multiple of 128): exercises the
    # pad-and-slice fallback instead of one oversized block.
    B3, LEAD3 = 4, 1100
    theta3 = jax.random.normal(k3, (B3, LEAD3, 2), dtype=jnp.float32)
    out3 = jax.block_until_ready(theta_encoder(theta3))
    ref3 = _reference(theta3)
    assert out3.shape == (B3, LEAD3, 12), out3.shape
    assert jnp.allclose(out3, ref3, atol=1e-5, rtol=1e-5)

    print("KERNEL_OK")
</pallas_src>

<mosaic_0001>
module attributes {stable_mosaic.version = 11 : i64} {
  func.func @_theta_encoder_kernel(%arg0: i32, %arg1: i32, %arg2: memref<2x2x8xf32, #tpu.memory_space<vmem>>, %arg3: memref<12x2x8xf32, #tpu.memory_space<vmem>>) attributes {dimension_semantics = [#tpu.dimension_semantics<parallel>, #tpu.dimension_semantics<parallel>], iteration_bounds = array<i64: 1, 1>, scalar_prefetch = 0 : i64, scratch_operands = 0 : i64, tpu.core_type = #tpu.core_type<tc>, window_params = [{transform_indices = @transform_0, window_bounds = array<i64: 2, 2, 8>}, {transform_indices = @transform_1, window_bounds = array<i64: 12, 2, 8>}]} {
    %c0 = arith.constant 0 : index
    %c0_0 = arith.constant 0 : index
    %c0_1 = arith.constant 0 : index
    %0 = vector.load %arg2[%c0, %c0_0, %c0_1] : memref<2x2x8xf32, #tpu.memory_space<vmem>>, vector<1x2x8xf32>
    %1 = vector.shape_cast %0 : vector<1x2x8xf32> to vector<2x8xf32>
    %c1 = arith.constant 1 : index
    %c0_2 = arith.constant 0 : index
    %c0_3 = arith.constant 0 : index
    %2 = vector.load %arg2[%c1, %c0_2, %c0_3] : memref<2x2x8xf32, #tpu.memory_space<vmem>>, vector<1x2x8xf32>
    %3 = vector.shape_cast %2 : vector<1x2x8xf32> to vector<2x8xf32>
    %4 = math.sin %1 : vector<2x8xf32>
    %5 = math.cos %1 : vector<2x8xf32>
    %6 = math.sin %3 : vector<2x8xf32>
    %7 = math.cos %3 : vector<2x8xf32>
    %8 = arith.mulf %4, %7 : vector<2x8xf32>
    %9 = arith.mulf %5, %6 : vector<2x8xf32>
    %10 = arith.mulf %5, %7 : vector<2x8xf32>
    %11 = arith.mulf %4, %6 : vector<2x8xf32>
    %c0_4 = arith.constant 0 : index
    %c0_5 = arith.constant 0 : index
    %c0_6 = arith.constant 0 : index
    %12 = vector.load %arg3[%c0_4, %c0_5, %c0_6] : memref<12x2x8xf32, #tpu.memory_space<vmem>>, vector<1x2x8xf32>
    %13 = vector.shape_cast %12 : vector<1x2x8xf32> to vector<2x8xf32>
    %14 = vector.shape_cast %1 : vector<2x8xf32> to vector<1x2x8xf32>
    tpu.vector_store %arg3[%c0_4, %c0_5, %c0_6], %14 {strides = array<i32>} : memref<12x2x8xf32, #tpu.memory_space<vmem>>, vector<1x2x8xf32>,
    %c1_7 = arith.constant 1 : index
    %c0_8 = arith.constant 0 : index
    %c0_9 = arith.constant 0 : index
    %15 = vector.load %arg3[%c1_7, %c0_8, %c0_9] : memref<12x2x8xf32, #tpu.memory_space<vmem>>, vector<1x2x8xf32>
    %16 = vector.shape_cast %15 : vector<1x2x8xf32> to vector<2x8xf32>
    %17 = vector.shape_cast %4 : vector<2x8xf32> to vector<1x2x8xf32>
    tpu.vector_store %arg3[%c1_7, %c0_8, %c0_9], %17 {strides = array<i32>} : memref<12x2x8xf32, #tpu.memory_space<vmem>>, vector<1x2x8xf32>,
    %c2 = arith.constant 2 : index
    %c0_10 = arith.constant 0 : index
    %c0_11 = arith.constant 0 : index
    %18 = vector.load %arg3[%c2, %c0_10, %c0_11] : memref<12x2x8xf32, #tpu.memory_space<vmem>>, vector<1x2x8xf32>
    %19 = vector.shape_cast %18 : vector<1x2x8xf32> to vector<2x8xf32>
    %20 = vector.shape_cast %5 : vector<2x8xf32> to vector<1x2x8xf32>
    tpu.vector_store %arg3[%c2, %c0_10, %c0_11], %20 {strides = array<i32>} : memref<12x2x8xf32, #tpu.memory_space<vmem>>, vector<1x2x8xf32>,
    %c3 = arith.constant 3 : index
    %c0_12 = arith.constant 0 : index
    %c0_13 = arith.constant 0 : index
    %21 = vector.load %arg3[%c3, %c0_12, %c0_13] : memref<12x2x8xf32, #tpu.memory_space<vmem>>, vector<1x2x8xf32>
    %22 = vector.shape_cast %21 : vector<1x2x8xf32> to vector<2x8xf32>
    %23 = vector.shape_cast %3 : vector<2x8xf32> to vector<1x2x8xf32>
    tpu.vector_store %arg3[%c3, %c0_12, %c0_13], %23 {strides = array<i32>} : memref<12x2x8xf32, #tpu.memory_space<vmem>>, vector<1x2x8xf32>,
    %c4 = arith.constant 4 : index
    %c0_14 = arith.constant 0 : index
    %c0_15 = arith.constant 0 : index
    %24 = vector.load %arg3[%c4, %c0_14, %c0_15] : memref<12x2x8xf32, #tpu.memory_space<vmem>>, vector<1x2x8xf32>
    %25 = vector.shape_cast %24 : vector<1x2x8xf32> to vector<2x8xf32>
    %26 = vector.shape_cast %6 : vector<2x8xf32> to vector<1x2x8xf32>
    tpu.vector_store %arg3[%c4, %c0_14, %c0_15], %26 {strides = array<i32>} : memref<12x2x8xf32, #tpu.memory_space<vmem>>, vector<1x2x8xf32>,
    %c5 = arith.constant 5 : index
    %c0_16 = arith.constant 0 : index
    %c0_17 = arith.constant 0 : index
    %27 = vector.load %arg3[%c5, %c0_16, %c0_17] : memref<12x2x8xf32, #tpu.memory_space<vmem>>, vector<1x2x8xf32>
    %28 = vector.shape_cast %27 : vector<1x2x8xf32> to vector<2x8xf32>
    %29 = vector.shape_cast %7 : vector<2x8xf32> to vector<1x2x8xf32>
    tpu.vector_store %arg3[%c5, %c0_16, %c0_17], %29 {strides = array<i32>} : memref<12x2x8xf32, #tpu.memory_space<vmem>>, vector<1x2x8xf32>,
    %30 = arith.addf %1, %3 : vector<2x8xf32>
    %c6 = arith.constant 6 : index
    %c0_18 = arith.constant 0 : index
    %c0_19 = arith.constant 0 : index
    %31 = vector.load %arg3[%c6, %c0_18, %c0_19] : memref<12x2x8xf32, #tpu.memory_space<vmem>>, vector<1x2x8xf32>
    %32 = vector.shape_cast %31 : vector<1x2x8xf32> to vector<2x8xf32>
    %33 = vector.shape_cast %30 : vector<2x8xf32> to vector<1x2x8xf32>
    tpu.vector_store %arg3[%c6, %c0_18, %c0_19], %33 {strides = array<i32>} : memref<12x2x8xf32, #tpu.memory_space<vmem>>, vector<1x2x8xf32>,
    %34 = arith.addf %8, %9 : vector<2x8xf32>
    %c7 = arith.constant 7 : index
    %c0_20 = arith.constant 0 : index
    %c0_21 = arith.constant 0 : index
    %35 = vector.load %arg3[%c7, %c0_20, %c0_21] : memref<12x2x8xf32, #tpu.memory_space<vmem>>, vector<1x2x8xf32>
    %36 = vector.shape_cast %35 : vector<1x2x8xf32> to vector<2x8xf32>
    %37 = vector.shape_cast %34 : vector<2x8xf32> to vector<1x2x8xf32>
    tpu.vector_store %arg3[%c7, %c0_20, %c0_21], %37 {strides = array<i32>} : memref<12x2x8xf32, #tpu.memory_space<vmem>>, vector<1x2x8xf32>,
    %38 = arith.subf %10, %11 : vector<2x8xf32>
    %c8 = arith.constant 8 : index
    %c0_22 = arith.constant 0 : index
    %c0_23 = arith.constant 0 : index
    %39 = vector.load %arg3[%c8, %c0_22, %c0_23] : memref<12x2x8xf32, #tpu.memory_space<vmem>>, vector<1x2x8xf32>
    %40 = vector.shape_cast %39 : vector<1x2x8xf32> to vector<2x8xf32>
    %41 = vector.shape_cast %38 : vector<2x8xf32> to vector<1x2x8xf32>
    tpu.vector_store %arg3[%c8, %c0_22, %c0_23], %41 {strides = array<i32>} : memref<12x2x8xf32, #tpu.memory_space<vmem>>, vector<1x2x8xf32>,
    %42 = arith.subf %1, %3 : vector<2x8xf32>
    %c9 = arith.constant 9 : index
    %c0_24 = arith.constant 0 : index
    %c0_25 = arith.constant 0 : index
    %43 = vector.load %arg3[%c9, %c0_24, %c0_25] : memref<12x2x8xf32, #tpu.memory_space<vmem>>, vector<1x2x8xf32>
    %44 = vector.shape_cast %43 : vector<1x2x8xf32> to vector<2x8xf32>
    %45 = vector.shape_cast %42 : vector<2x8xf32> to vector<1x2x8xf32>
    tpu.vector_store %arg3[%c9, %c0_24, %c0_25], %45 {strides = array<i32>} : memref<12x2x8xf32, #tpu.memory_space<vmem>>, vector<1x2x8xf32>,
    %46 = arith.subf %8, %9 : vector<2x8xf32>
    %c10 = arith.constant 10 : index
    %c0_26 = arith.constant 0 : index
    %c0_27 = arith.constant 0 : index
    %47 = vector.load %arg3[%c10, %c0_26, %c0_27] : memref<12x2x8xf32, #tpu.memory_space<vmem>>, vector<1x2x8xf32>
    %48 = vector.shape_cast %47 : vector<1x2x8xf32> to vector<2x8xf32>
    %49 = vector.shape_cast %46 : vector<2x8xf32> to vector<1x2x8xf32>
    tpu.vector_store %arg3[%c10, %c0_26, %c0_27], %49 {strides = array<i32>} : memref<12x2x8xf32, #tpu.memory_space<vmem>>, vector<1x2x8xf32>,
    %50 = arith.addf %10, %11 : vector<2x8xf32>
    %c11 = arith.constant 11 : index
    %c0_28 = arith.constant 0 : index
    %c0_29 = arith.constant 0 : index
    %51 = vector.load %arg3[%c11, %c0_28, %c0_29] : memref<12x2x8xf32, #tpu.memory_space<vmem>>, vector<1x2x8xf32>
    %52 = vector.shape_cast %51 : vector<1x2x8xf32> to vector<2x8xf32>
    %53 = vector.shape_cast %50 : vector<2x8xf32> to vector<1x2x8xf32>
    tpu.vector_store %arg3[%c11, %c0_28, %c0_29], %53 {strides = array<i32>} : memref<12x2x8xf32, #tpu.memory_space<vmem>>, vector<1x2x8xf32>,
    return
  }
  func.func @transform_0(%arg0: i32, %arg1: i32) -> (i32, i32, i32) {
    %c0_i32 = arith.constant 0 : i32
    %c0_i32_0 = arith.constant 0 : i32
    return %c0_i32, %arg0, %arg1 : i32, i32, i32
  }
  func.func @transform_1(%arg0: i32, %arg1: i32) -> (i32, i32, i32) {
    %c0_i32 = arith.constant 0 : i32
    %c0_i32_0 = arith.constant 0 : i32
    return %c0_i32, %arg0, %arg1 : i32, i32, i32
  }
}

</mosaic_0001>

<bundles_post_ra>
// kernel: tpu_custom_call.1
= control target key start
LH: loop header
LB: loop body
LE: loop exit
PB: predicated region body
PF: predicated region fallthrough
CT: control target
= control target key end

     0   :  { %6 = vsyncpa [#allocation3], 0  ;;  %s554_s6 = smov [#allocation2]   ;;  %s709_s0 = inlined_call_operand.hbm [shape: f32[2,2,8], index: 0, kind: input, shape index: {}]   ;;  %s710_s1 = inlined_call_operand.vmem [shape: f32[12,2,8], index: 1, kind: output, shape index: {}]  }
   0x1   :  { %s12_s7 = sshll.u32 %s554_s6, 4  ;;  %s530_s10 = scalar_lea.hbm %s709_s0, 64  ;;  %s13_s7 = int_to_ptr.vmem [resolvable:$true] %s12_s7 }
   0x2   :  { %p531_p0 = scmp.ne.s32.totalorder %s709_s0, %s530_s10  ;;  %p534_p1 = scmp.lt.u32.totalorder %s530_s10, %s709_s0 }
   0x4   :  { %p536_p2 = pnand %p534_p1, %p531_p0 }
   0x6   :  { %539 = shalt.err (!%p536_p2)
}
   0x7   :  { %s540_s15 = scalar_lea.vmem %s13_s7, 64  ;;  %p545_p4 = scmp.lt.s32.totalorder %s13_s7, %s13_s7 }
   0x8   :  { %p541_p3 = scmp.ne.s32.totalorder %s13_s7, %s540_s15  ;;  %p546_p5 = scmp.lt.s32.totalorder %s540_s15, %s540_s15 }
   0xa   :  { %p547_p6 = por %p546_p5, %p545_p4 }
   0xc   :  { %p548_p7 = pnand %p547_p6, %p541_p3 }
   0xe   :  { %551 = shalt.err (!%p548_p7)
}
   0xf   :  { %s555_s16 = smov 32   ;;  %s556_s17 = smov 2  }
  0x10   :  { %18 = dma.hbm_to_vmem [thread:$0]  %s709_s0, 64, %s13_s7, [#allocation3], %s555_s16, %s555_s16, %s556_s17  }
  0x11   :  { %552 = dma.done.wait [#allocation3], 64  }
  0x12   :  { %553 = vsyncadd [#allocation3], 4294967232  ;;  %vm443_vm0 = vcmask 58368   ;;  %v585_v0 = vld [vmem:[#allocation2] sm:$0x3] }
  0x13   :  { %v587_v1 = vld [vmem:[#allocation2 + $0x2] sm:$0x3]  ;;  %v28_v2 = vand.u32 2139095040, %v585_v0  ;;  %444 = vst.msk [vmem:[%s710_s1] sm:$0x3] %vm443_vm0, %v585_v0  ;;  %vm27_vm15 = vcmp.lt.s32.totalorder %v585_v0, 0 }
  0x14   :  { %v25_v3 = vand.u32 2147483647, %v585_v0  ;;  %496 = vst.msk [vmem:[%s710_s1 + $0x6] sm:$0x3] %vm443_vm0, %v587_v1  ;;  %v235_v4 = vand.u32 2139095040, %v587_v1  ;;  %v455_v7 = vadd.f32 %v587_v1, %v585_v0  ;;  %v464_v11 = vsub.f32 %v585_v0, %v587_v1 }
  0x15   :  { %v232_v5 = vand.u32 2147483647, %v587_v1  ;;  %v29_v6 = vshrl.u32 %v28_v2, 23  ;;  %v557_v26 = vmov 683565275  }
  0x16   :  { %v32_v8 = vand.u32 8388607, %v25_v3  ;;  %v236_v9 = vshrl.u32 %v235_v4, 23  ;;  %499 = vst.msk [vmem:[%s710_s1 + $0xc] sm:$0x3] %vm443_vm0, %v455_v7 }
  0x17   :  { %v239_v10 = vand.u32 8388607, %v232_v5  ;;  %v478_v12 = vadd.s32 4294967169, %v29_v6  ;;  %502 = vst.msk [vmem:[%s710_s1 + $0x12] sm:$0x3] %vm443_vm0, %v464_v11 }
  0x18   :  { %v486_v13 = vadd.s32 4294967169, %v236_v9  ;;  %v33_v15 = vor.u32 8388608, %v32_v8  ;;  %v558_v28 = vmov 2475754826   ;;  %v559_v30 = vmov 2131351028  }
  0x19   :  { %v35_v14 = vadd.s32 1, %v478_v12  ;;  %v240_v17 = vor.u32 8388608, %v239_v10  ;;  %v560_v32 = vmov 2102212464   ;;  %v561_v34 = vmov 920167782  }
  0x1a   :  { %v242_v16 = vadd.s32 1, %v486_v13  ;;  %v619_v22 = vshll.u32 %v33_v15, 8  ;;  %v562_v42 = vmov 1326507024  }
  0x1b   :  { %vm36_vm1 = vcmp.gt.s32.totalorder %v35_v14, 0  ;;  %v621_v24 = vshll.u32 %v240_v17, 8 }
  0x1c   :  { %v37_v18 = vsel %vm36_vm1, %v35_v14, 0  ;;  %vm243_vm2 = vcmp.gt.s32.totalorder %v242_v16, 0  ;;  %vm26_vm1 = vcmp.le.f32.partialorder %v25_v3, 0.7853982 }
  0x1d   :  { %v38_v19 = vshrl.u32 %v37_v18, 5  ;;  %v39_v20 = vand.u32 31, %v37_v18  ;;  %v244_v21 = vsel %vm243_vm2, %v242_v16, 0  ;;  %vm234_vm2 = vcmp.lt.s32.totalorder %v587_v1, 0 }
  0x1e   :  { %v246_v23 = vand.u32 31, %v244_v21  ;;  %v623_v36 = vshrl.u32 %v244_v21, 5 }
  0x1f   :  { %v40_v25 = vsub.s32 32, %v39_v20  ;;  %v42_v27 = vshll.u32 %v557_v26, %v39_v20  ;;  %v45_v29 = vshll.u32 %v558_v28, %v39_v20  ;;  %v48_v31 = vshll.u32 %v559_v30, %v39_v20 }
  0x20   :  { %v51_v33 = vshll.u32 %v560_v32, %v39_v20  ;;  %v54_v35 = vshll.u32 %v561_v34, %v39_v20  ;;  %vm57_vm3 = vcmp.lt.s32.totalorder %v38_v19, 1  ;;  %vm58_vm4 = vcmp.lt.s32.totalorder %v38_v19, 2 }
  0x21   :  { %v41_v37 = vshrl.u32 %v557_v26, %v40_v25  ;;  %v43_v38 = vshrl.u32 %v558_v28, %v40_v25  ;;  %v46_v39 = vshrl.u32 %v559_v30, %v40_v25  ;;  %v49_v40 = vshrl.u32 %v560_v32, %v40_v25 }
  0x22   :  { %v52_v41 = vshrl.u32 %v561_v34, %v40_v25  ;;  %v55_v43 = vshrl.u32 %v562_v42, %v40_v25  ;;  %vm60_vm5 = vcmp.lt.s32.totalorder %v38_v19, 4  ;;  %v247_v47 = vsub.s32 32, %v246_v23 }
  0x23   :  { %v44_v44 = vor.u32 %v43_v38, %v42_v27  ;;  %v47_v45 = vor.u32 %v46_v39, %v45_v29  ;;  %v50_v46 = vor.u32 %v49_v40, %v48_v31  ;;  %vm59_vm6 = vcmp.lt.s32.totalorder %v38_v19, 3 }
  0x24   :  { %v53_v48 = vor.u32 %v52_v41, %v51_v33  ;;  %v56_v49 = vor.u32 %v55_v43, %v54_v35  ;;  %v249_v50 = vshll.u32 %v557_v26, %v246_v23  ;;  %v252_v58 = vshll.u32 %v558_v28, %v246_v23 }
  0x25   :  { %v61_v51 = vsel %vm57_vm3, %v41_v37, %v44_v44  ;;  %v62_v52 = vsel %vm60_vm5, %v50_v46, 2102212464  ;;  %v65_v53 = vsel %vm57_vm3, %v44_v44, %v47_v45  ;;  %v69_v54 = vsel %vm57_vm3, %v47_v45, %v50_v46 }
  0x26   :  { %v63_v55 = vsel %vm59_vm6, %v47_v45, %v62_v52  ;;  %v66_v56 = vsel %vm60_vm5, %v53_v48, 920167782  ;;  %v70_v57 = vsel %vm60_vm5, %v56_v49, 1326507024  ;;  %v248_v61 = vshrl.u32 %v557_v26, %v247_v47 }
  0x27   :  { %v67_v59 = vsel %vm59_vm6, %v50_v46, %v66_v56  ;;  %v71_v60 = vsel %vm59_vm6, %v53_v48, %v70_v57  ;;  %v250_v62 = vshrl.u32 %v558_v28, %v247_v47  ;;  %v64_v63 = vsel %vm58_vm4, %v61_v51, %v63_v55 }
  0x28   :  { %v68_v2 = vsel %vm58_vm4, %v65_v53, %v67_v59  ;;  %v72_v4 = vsel %vm58_vm4, %v69_v54, %v71_v60  ;;  %v253_v6 = vshrl.u32 %v559_v30, %v247_v47  ;;  %v255_v13 = vshll.u32 %v559_v30, %v246_v23 }
  0x29   :  { %v632_v7 = vmul.u32.u64.low %v619_v22, %v72_v4  ;;  %v633_v8 = vmul.u32.u64.high %v619_v22, %v72_v4, %v632_v7  ;;  %v636_v9 = vmul.u32.u64.low %v619_v22, %v68_v2  ;;  %v637_v10 = vmul.u32.u64.high %v619_v22, %v68_v2, %v636_v9 }
  0x2a   :  { %v251_v11 = vor.u32 %v250_v62, %v249_v50  ;;  %v254_v12 = vor.u32 %v253_v6, %v252_v58  ;;  %v256_v14 = vshrl.u32 %v560_v32, %v247_v47  ;;  %v258_v15 = vshll.u32 %v560_v32, %v246_v23 }
  0x2b   :  { %v259_v16 = vshrl.u32 %v561_v34, %v247_v47  ;;  %v261_v17 = vshll.u32 %v561_v34, %v246_v23  ;;  %v262_v18 = vshrl.u32 %v562_v42, %v247_v47  ;;  %v80_v19 = vmul.u32 %v619_v22, %v64_v63 }
  0x2c   :  { %v257_v20 = vor.u32 %v256_v14, %v255_v13  ;;  %vm264_vm7 = vcmp.lt.s32.totalorder %v623_v36, 1  ;;  %vm265_vm8 = vcmp.lt.s32.totalorder %v623_v36, 2  ;;  %vm82_vm9 = vc.u32 %v633_v8, %v636_v9 }
  0x2d   :  { %v83_v21 = vadd.s32 1, %v637_v10  ;;  %v260_v25 = vor.u32 %v259_v16, %v258_v15  ;;  %vm266_vm10 = vcmp.lt.s32.totalorder %v623_v36, 3  ;;  %v263_v26 = vor.u32 %v262_v18, %v261_v17 }
  0x2e   :  { %vm267_vm11 = vcmp.lt.s32.totalorder %v623_v36, 4  ;;  %v268_v27 = vsel %vm264_vm7, %v248_v61, %v251_v11  ;;  %v272_v23 = vsel %vm264_vm7, %v251_v11, %v254_v12  ;;  %v276_v30 = vsel %vm264_vm7, %v254_v12, %v257_v20 }
  0x2f   :  { %v84_v28 = vsel %vm82_vm9, %v83_v21, %v637_v10  ;;  %v269_v22 = vsel %vm267_vm11, %v257_v20, 2102212464  ;;  %v273_v29 = vsel %vm267_vm11, %v260_v25, 920167782  ;;  %v277_v34 = vsel %vm267_vm11, %v263_v26, 1326507024 }
  0x30   :  { %v85_v31 = vadd.s32 %v84_v28, %v80_v19  ;;  %v270_v32 = vsel %vm266_vm10, %v254_v12, %v269_v22  ;;  %v274_v33 = vsel %vm266_vm10, %v257_v20, %v273_v29  ;;  %v278_v38 = vsel %vm266_vm10, %v260_v25, %v277_v34 }
  0x31   :  { %v271_v35 = vsel %vm265_vm8, %v268_v27, %v270_v32  ;;  %v275_v37 = vsel %vm265_vm8, %v272_v23, %v274_v33  ;;  %v279_v40 = vsel %vm265_vm8, %v276_v30, %v278_v38  ;;  %v81_v59 = vadd.s32 %v636_v9, %v633_v8 }
  0x32   :  { %v86_v39 = vadd.s32 536870912, %v85_v31  ;;  %v654_v41 = vmul.u32.u64.low %v621_v24, %v275_v37  ;;  %v655_v42 = vmul.u32.u64.high %v621_v24, %v275_v37, %v654_v41  ;;  %v287_v46 = vmul.u32 %v621_v24, %v271_v35 }
  0x33   :  { %v658_v43 = vmul.u32.u64.low %v621_v24, %v279_v40  ;;  %v659_v44 = vmul.u32.u64.high %v621_v24, %v279_v40, %v658_v43  ;;  %vm233_vm3 = vcmp.le.f32.partialorder %v232_v5, 0.7853982  ;;  %vm117_vm10 = vweird.f32 %v585_v0 }
  0x34   :  { %v87_v45 = vshrl.u32 %v86_v39, 30  ;;  %v290_v48 = vadd.s32 1, %v655_v42 }
  0x35   :  { %vm289_vm12 = vc.u32 %v659_v44, %v654_v41  ;;  %v288_v15 = vadd.s32 %v654_v41, %v659_v44 }
  0x36   :  { %v88_v47 = vshll.u32 %v87_v45, 30  ;;  %v291_v36 = vsel %vm289_vm12, %v290_v48, %v655_v42  ;;  %v111_v8 = vsub.s32 4, %v87_v45 }
  0x37   :  { %v292_v50 = vadd.s32 %v291_v36, %v287_v46 }
  0x38   :  { %v89_v49 = vsub.s32 %v85_v31, %v88_v47  ;;  %v112_v27 = vsel %vm27_vm15, %v111_v8, %v87_v45 }
  0x39   :  { %v293_v52 = vadd.s32 536870912, %v292_v50  ;;  %v114_v30 = vsel %vm26_vm1, 0, %v112_v27 }
  0x3a   :  { %v91_v51 = vsub.s32 0, %v89_v49  ;;  %v118_v35 = vadd.s32 3, %v114_v30  ;;  %v222_v40 = vand.u32 3, %v114_v30 }
  0x3b   :  { %v294_v54 = vshrl.u32 %v293_v52, 30 }
  0x3c   :  { %v479_v53 = vmin.u32 %v91_v51, %v89_v49  ;;  %v119_v39 = vand.u32 3, %v118_v35  ;;  %vm227_vm5 = vcmp.eq.s32.totalorder %v222_v40, 2  ;;  %vm224_vm7 = vcmp.eq.s32.totalorder %v222_v40, 0 }
  0x3d   :  { %v295_v56 = vshll.u32 %v294_v54, 30  ;;  %v318_v34 = vsub.s32 4, %v294_v54  ;;  %vm223_vm9 = vcmp.lt.s32.totalorder %v222_v40, 2 }
  0x3e   :  { %v93_v55 = vclz %v479_v53  ;;  %vm124_vm4 = vcmp.eq.s32.totalorder %v119_v39, 2  ;;  %vm121_vm6 = vcmp.eq.s32.totalorder %v119_v39, 0  ;;  %vm120_vm8 = vcmp.lt.s32.totalorder %v119_v39, 2 }
  0x3f   :  { %v296_v58 = vsub.s32 %v292_v50, %v295_v56  ;;  %v319_v38 = vsel %vm234_vm2, %v318_v34, %v294_v54 }
  0x40   :  { %v480_v57 = vadd.s32 4294967294, %v93_v55  ;;  %v321_v43 = vsel %vm233_vm3, 0, %v319_v38 }
  0x41   :  { %v298_v60 = vsub.s32 0, %v296_v58  ;;  %v325_v47 = vadd.s32 3, %v321_v43  ;;  %v429_v54 = vand.u32 3, %v321_v43 }
  0x42   :  { %vm481_vm13 = vcmp.lt.s32.totalorder %v480_v57, 0 }
  0x43   :  { %v96_v24 = vsel %vm481_vm13, 0, %v480_v57  ;;  %v487_v2 = vmin.u32 %v298_v60, %v296_v58  ;;  %v326_v53 = vand.u32 3, %v325_v47  ;;  %vm434_vm12 = vcmp.eq.s32.totalorder %v429_v54, 2 }
  0x44   :  { %v97_v61 = vsub.s32 32, %v96_v24  ;;  %v98_v62 = vshll.u32 %v89_v49, %v96_v24  ;;  %v101_v63 = vsub.s32 4294967266, %v96_v24 }
  0x45   :  { %v300_v7 = vclz %v487_v2  ;;  %vm331_vm11 = vcmp.eq.s32.totalorder %v326_v53, 2  ;;  %vm328_vm13 = vcmp.eq.s32.totalorder %v326_v53, 0 }
  0x46   :  { %v99_v4 = vshrl.u32 %v81_v59, %v97_v61  ;;  %v102_v6 = vadd.s32 127, %v101_v63 }
  0x47   :  { %v488_v12 = vadd.s32 4294967294, %v300_v7 }
  0x48   :  { %v100_v10 = vor.u32 %v99_v4, %v98_v62  ;;  %v103_v11 = vshll.u32 %v102_v6, 23 }
  0x49   :  { %vm489_vm14 = vcmp.lt.s32.totalorder %v488_v12, 0 }
  0x4a   :  { %v104_v13 = vor.u32 4788187, %v103_v11  ;;  %v107_v14 = vcvt.s32.f32 %v100_v10  ;;  %v303_v9 = vsel %vm489_vm14, 0, %v488_v12  ;;  %vm431_vm14 = vcmp.eq.s32.totalorder %v429_v54, 0 }
  0x4b   :  { %v304_v17 = vsub.s32 32, %v303_v9  ;;  %v305_v18 = vshll.u32 %v296_v58, %v303_v9  ;;  %v308_v19 = vsub.s32 4294967266, %v303_v9 }
  0x4c   :  { %v105_v16 = vand.u32 2147483647, %v104_v13 }
  0x4d   :  { %v306_v21 = vshrl.u32 %v288_v15, %v304_v17  ;;  %v309_v25 = vadd.s32 127, %v308_v19 }
  0x4e   :  { %v108_v20 = vmul.f32 %v107_v14, %v105_v16 }
  0x4f   :  { %v307_v23 = vor.u32 %v306_v21, %v305_v18  ;;  %v310_v28 = vshll.u32 %v309_v25, 23 }
  0x50   :  { %v109_v26 = vxor.u32 2147483648, %v108_v20 }
  0x51   :  { %v311_v31 = vor.u32 4788187, %v310_v28  ;;  %v314_v32 = vcvt.s32.f32 %v307_v23 }
  0x52   :  { %v110_v22 = vsel %vm27_vm15, %v109_v26, %v108_v20  ;;  %vm327_vm15 = vcmp.lt.s32.totalorder %v326_v53, 2 }
  0x53   :  { %v113_v29 = vsel %vm26_vm1, %v585_v0, %v110_v22  ;;  %v312_v33 = vand.u32 2147483647, %v311_v31  ;;  %vm430_vm1 = vcmp.lt.s32.totalorder %v429_v54, 2 }
  0x54   :  { %522 = vcosq.f32 %v113_v29 }
  0x55   :  { %524 = vsinq.f32 %v113_v29  ;;  %v315_v37 = vmul.f32 %v314_v32, %v312_v33 }
  0x57   :  { %v316_v3 = vxor.u32 2147483648, %v315_v37 }
  0x59   :  { %v317_v41 = vsel %vm234_vm2, %v316_v3, %v315_v37  ;;  %vm324_vm2 = vweird.f32 %v587_v1 }
  0x5a   :  { %v320_v42 = vsel %vm233_vm3, %v587_v1, %v317_v41 }
  0x5b   :  { %526 = vcosq.f32 %v320_v42 }
  0x5c   :  { %528 = vsinq.f32 %v320_v42 }
  0x5e   :  { %v523_v44 = vpop.eup %522 }
  0x5f   :  { %v525_v45 = vpop.eup %524  ;;  %v125_v46 = vxor.u32 2147483648, %v523_v44 }
  0x60   :  { %v122_v5 = vxor.u32 2147483648, %v525_v45 }
  0x61   :  { %v126_v48 = vsel %vm124_vm4, %v125_v46, %v525_v45  ;;  %v229_v49 = vsel %vm227_vm5, %v125_v46, %v525_v45 }
  0x62   :  { %v123_v36 = vsel %vm121_vm6, %v523_v44, %v122_v5  ;;  %v226_v50 = vsel %vm224_vm7, %v523_v44, %v122_v5 }
  0x63   :  { %v127_v51 = vsel %vm120_vm8, %v123_v36, %v126_v48  ;;  %v230_v52 = vsel %vm223_vm9, %v226_v50, %v229_v49 }
  0x64   :  { %v128_v55 = vsel %vm117_vm10, nan, %v127_v51  ;;  %v231_v56 = vsel %vm117_vm10, nan, %v230_v52 }
  0x65   :  { %494 = vst.msk [vmem:[%s710_s1 + $0x2] sm:$0x3] %vm443_vm0, %v128_v55  ;;  %495 = vst.msk [vmem:[%s710_s1 + $0x4] sm:$0x3] %vm443_vm0, %v231_v56  ;;  %v527_v0 = vpop.eup %526 }
  0x66   :  { %v529_v57 = vpop.eup %528  ;;  %v332_v58 = vxor.u32 2147483648, %v527_v0 }
  0x67   :  { %v329_v59 = vxor.u32 2147483648, %v529_v57 }
  0x68   :  { %v333_v24 = vsel %vm331_vm11, %v332_v58, %v529_v57  ;;  %v436_v60 = vsel %vm434_vm12, %v332_v58, %v529_v57 }
  0x69   :  { %v330_v61 = vsel %vm328_vm13, %v527_v0, %v329_v59  ;;  %v433_v62 = vsel %vm431_vm14, %v527_v0, %v329_v59 }
  0x6a   :  { %v334_v63 = vsel %vm327_vm15, %v330_v61, %v333_v24  ;;  %v437_v2 = vsel %vm430_vm1, %v433_v62, %v436_v60 }
  0x6b   :  { %v335_v4 = vsel %vm324_vm2, nan, %v334_v63  ;;  %v438_v6 = vsel %vm324_vm2, nan, %v437_v2 }
  0x6c   :  { %v440_v7 = vmul.f32 %v335_v4, %v231_v56  ;;  %v442_v10 = vmul.f32 %v335_v4, %v128_v55  ;;  %497 = vst.msk [vmem:[%s710_s1 + $0x8] sm:$0x3] %vm443_vm0, %v335_v4  ;;  %v439_v11 = vmul.f32 %v438_v6, %v128_v55  ;;  %v441_v12 = vmul.f32 %v438_v6, %v231_v56 }
  0x6d   :  { %498 = vst.msk [vmem:[%s710_s1 + $0xa] sm:$0x3] %vm443_vm0, %v438_v6 }
  0x6e   :  { %v458_v1 = vadd.f32 %v440_v7, %v439_v11  ;;  %v461_v13 = vsub.f32 %v441_v12, %v442_v10  ;;  %v467_v14 = vsub.f32 %v439_v11, %v440_v7  ;;  %v470_v15 = vadd.f32 %v442_v10, %v441_v12 }
  0x70   :  { %500 = vst.msk [vmem:[%s710_s1 + $0xe] sm:$0x3] %vm443_vm0, %v458_v1  ;;  %501 = vst.msk [vmem:[%s710_s1 + $0x10] sm:$0x3] %vm443_vm0, %v461_v13 }
  0x71   :  { %503 = vst.msk [vmem:[%s710_s1 + $0x14] sm:$0x3] %vm443_vm0, %v467_v14  ;;  %504 = vst.msk [vmem:[%s710_s1 + $0x16] sm:$0x3] %vm443_vm0, %v470_v15 }
  0x72   :  { %477 = vsyncpa [#allocation3], 1 }

</bundles_post_ra>
